<compile_context>
chip_gen: v6e
topology: v6e:2x2x1
jax: 0.10.0
libtpu: 0.0.40
codegen_flags: <defaults>
</compile_context>

<pallas_src>
import jax
import jax.numpy as jnp
from jax import lax
from jax.experimental import pallas as pl
from jax.experimental.pallas import tpu as pltpu  # noqa: F401  (kept for TPU-specific tuning hooks)


def _gcn_batched(x_flat, adj, wg1, bg1, wg2, bg2, B, K):
    """Two-layer GCN over the whole batch (all operands resident in VMEM).

    x_flat: (B*K, indim)   adj: (B, K, K)
    Returns node features as a lane-dense (B*K, outdim) slab.
    """
    hiddim = wg1.shape[1]
    outdim = wg2.shape[1]

    # support_1 = X W_g1 on the flattened node axis (batch-independent matmul).
    s1 = jnp.dot(x_flat, wg1, preferred_element_type=jnp.float32)          # (B*K, hiddim)
    s1 = s1.reshape(B, K, hiddim)
    # h1 = relu(adj @ support_1 + b_g1), batched over B via dot_general.
    h1 = lax.dot_general(adj, s1,
                         dimension_numbers=(((2,), (1,)), ((0,), (0,))),
                         preferred_element_type=jnp.float32) + bg1         # (B, K, hiddim)
    h1 = jnp.maximum(h1, 0.0)
    # F.dropout(p=0.3) is identity in eval mode (deterministic synthetic kernel).

    # support_2 = H1 W_g2, again on the flattened node axis.
    s2 = jnp.dot(h1.reshape(B * K, hiddim), wg2,
                 preferred_element_type=jnp.float32)                       # (B*K, outdim)
    s2 = s2.reshape(B, K, outdim)
    out = lax.dot_general(adj, s2,
                          dimension_numbers=(((2,), (1,)), ((0,), (0,))),
                          preferred_element_type=jnp.float32) + bg2        # (B, K, outdim)
    return out.reshape(B * K, outdim)


def _graph_module_kernel(x_ref, w1_ref, b1_ref, w2_ref, b2_ref,
                         wg1_ref, bg1_ref, wg2_ref, bg2_ref,
                         adj_ref, out_ref):
    """Full forward (adjacency construction + GCN) for the entire batch."""
    B, K, _ = adj_ref.shape
    outdim = w1_ref.shape[1]

    x = x_ref[...]                                          # (B*K, indim) float32

    # ---- get_adj: two edge MLP layers + relu, on flattened nodes ----
    h = jnp.dot(x, w1_ref[...], preferred_element_type=jnp.float32) + b1_ref[...]
    h = jnp.maximum(h, 0.0)
    h = jnp.dot(h, w2_ref[...], preferred_element_type=jnp.float32) + b2_ref[...]
    h = jnp.maximum(h, 0.0)                                 # (B*K, outdim)
    h3 = h.reshape(B, K, outdim)

    # ---- adjacency: h h^T (last-dim contraction, no explicit transpose) ----
    A = lax.dot_general(h3, h3,
                        dimension_numbers=(((2,), (2,)), ((0,), (0,))),
                        preferred_element_type=jnp.float32)  # (B, K, K)

    # add self loops: A + I_K (broadcast over batch)
    row = lax.broadcasted_iota(jnp.int32, (K, K), 0)
    col = lax.broadcasted_iota(jnp.int32, (K, K), 1)
    A = A + (row == col).astype(jnp.float32)

    # symmetric degree normalization D^-1/2 A D^-1/2.  A is symmetric, so the
    # column sums equal the row sums; computing both orientations directly
    # avoids transposing the degree vector (both reduces are free XLU filler).
    d_row = jnp.sum(A, axis=2, keepdims=True)               # (B, K, 1)
    d_col = jnp.sum(A, axis=1, keepdims=True)               # (B, 1, K)
    adj = lax.rsqrt(d_row) * A * lax.rsqrt(d_col)
    adj_ref[...] = adj

    # ---- GCN on the normalized adjacency ----
    out_ref[...] = _gcn_batched(x, adj,
                                wg1_ref[...], bg1_ref[...],
                                wg2_ref[...], bg2_ref[...], B, K)


def _gcn_only_kernel(x_ref, adj_ref, wg1_ref, bg1_ref, wg2_ref, bg2_ref,
                     out_ref):
    """GCN only, used when a precomputed graph/adjacency is supplied."""
    B, K, _ = adj_ref.shape
    out_ref[...] = _gcn_batched(x_ref[...], adj_ref[...],
                                wg1_ref[...], bg1_ref[...],
                                wg2_ref[...], bg2_ref[...], B, K)


def init_graph_module_params(key, indim, hiddim, outdim):
    """Deterministic synthetic parameters (shapes from Graph_Module.__init__)."""
    ks = jax.random.split(key, 8)
    s = 0.1
    return {
        # edge_layer_1: Linear(indim, outdim)
        "w_e1": s * jax.random.normal(ks[0], (indim, outdim), jnp.float32),
        "b_e1": s * jax.random.normal(ks[1], (outdim,), jnp.float32),
        # edge_layer_2: Linear(outdim, outdim)
        "w_e2": s * jax.random.normal(ks[2], (outdim, outdim), jnp.float32),
        "b_e2": s * jax.random.normal(ks[3], (outdim,), jnp.float32),
        # GCN: GraphConvolution(indim, hiddim), GraphConvolution(hiddim, outdim)
        "w_g1": s * jax.random.normal(ks[4], (indim, hiddim), jnp.float32),
        "b_g1": s * jax.random.normal(ks[5], (hiddim,), jnp.float32),
        "w_g2": s * jax.random.normal(ks[6], (hiddim, outdim), jnp.float32),
        "b_g2": s * jax.random.normal(ks[7], (outdim,), jnp.float32),
    }


def graph_module_forward(params, graph_nodes, graph=None):
    """Pallas implementation of Graph_Module.forward.

    graph_nodes: (B, K, indim) float32
    graph:       None / empty, or (B, K, K) precomputed adjacency
    returns:     (adj (B, K, K), graph_encode_features (B, K, outdim))
    """
    B, K, indim = graph_nodes.shape
    hiddim = params["w_g1"].shape[1]
    outdim = params["w_g2"].shape[1]

    # Flatten the batch/node axes in the wrapper (free) so the kernel runs the
    # batch-independent matmuls as one (B*K, feat) operand.
    x_flat = graph_nodes.reshape(B * K, indim).astype(jnp.float32)
    # 2-D biases so every ref in the kernel is >= 2-D (TPU-friendly layout).
    b_e1 = params["b_e1"].reshape(1, outdim)
    b_e2 = params["b_e2"].reshape(1, outdim)
    b_g1 = params["b_g1"].reshape(1, hiddim)
    b_g2 = params["b_g2"].reshape(1, outdim)

    use_precomputed = graph is not None and graph.size > 0

    if not use_precomputed:
        # Single invocation, no grid: every array is a whole-array VMEM block
        # (total working set ~25 KiB), so there is no per-batch pipeline step
        # overhead and weights are resident for the whole kernel.
        adj, feats_flat = pl.pallas_call(
            _graph_module_kernel,
            out_shape=(
                jax.ShapeDtypeStruct((B, K, K), jnp.float32),
                jax.ShapeDtypeStruct((B * K, outdim), jnp.float32),
            ),
        )(x_flat, params["w_e1"], b_e1, params["w_e2"], b_e2,
          params["w_g1"], b_g1, params["w_g2"], b_g2)
        return adj, feats_flat.reshape(B, K, outdim)

    adj = graph.astype(jnp.float32)
    feats_flat = pl.pallas_call(
        _gcn_only_kernel,
        out_shape=jax.ShapeDtypeStruct((B * K, outdim), jnp.float32),
    )(x_flat, adj, params["w_g1"], b_g1, params["w_g2"], b_g2)
    return adj, feats_flat.reshape(B, K, outdim)


if __name__ == "__main__":
    B, K = 2, 8           # batch, number of graph nodes/objects
    indim, hiddim, outdim = 32, 48, 32

    key = jax.random.PRNGKey(0)
    k_param, k_data = jax.random.split(key)
    params = init_graph_module_params(k_param, indim, hiddim, outdim)
    graph_nodes = jax.random.normal(k_data, (B, K, indim), jnp.float32)
    empty_graph = jnp.zeros((0,), jnp.float32)   # graph.numel() == 0 branch

    adj, feats = graph_module_forward(params, graph_nodes, empty_graph)
    jax.block_until_ready((adj, feats))

    assert adj.shape == (B, K, K)
    assert feats.shape == (B, K, outdim)

    # Also exercise the precomputed-graph branch once (reuses the adj above).
    adj2, feats2 = graph_module_forward(params, graph_nodes, adj)
    jax.block_until_ready((adj2, feats2))
    assert adj2.shape == (B, K, K)
    assert feats2.shape == (B, K, outdim)

    print("KERNEL_OK")
</pallas_src>

<mosaic_0001>
module attributes {stable_mosaic.version = 11 : i64} {
  func.func @_graph_module_kernel(%arg0: memref<16x32xf32, #tpu.memory_space<vmem>>, %arg1: memref<32x32xf32, #tpu.memory_space<vmem>>, %arg2: memref<1x32xf32, #tpu.memory_space<vmem>>, %arg3: memref<32x32xf32, #tpu.memory_space<vmem>>, %arg4: memref<1x32xf32, #tpu.memory_space<vmem>>, %arg5: memref<32x48xf32, #tpu.memory_space<vmem>>, %arg6: memref<1x48xf32, #tpu.memory_space<vmem>>, %arg7: memref<48x32xf32, #tpu.memory_space<vmem>>, %arg8: memref<1x32xf32, #tpu.memory_space<vmem>>, %arg9: memref<2x8x8xf32, #tpu.memory_space<vmem>>, %arg10: memref<16x32xf32, #tpu.memory_space<vmem>>) attributes {dimension_semantics = [], scalar_prefetch = 0 : i64, scratch_operands = 0 : i64, tpu.core_type = #tpu.core_type<tc>} {
    %c0 = arith.constant 0 : index
    %c0_0 = arith.constant 0 : index
    %0 = vector.load %arg0[%c0, %c0_0] : memref<16x32xf32, #tpu.memory_space<vmem>>, vector<16x32xf32>
    %c0_1 = arith.constant 0 : index
    %c0_2 = arith.constant 0 : index
    %1 = vector.load %arg1[%c0_1, %c0_2] : memref<32x32xf32, #tpu.memory_space<vmem>>, vector<32x32xf32>
    %cst = arith.constant dense<0.000000e+00> : vector<16x32xf32>
    %2 = tpu.matmul %0, %1, %cst {dimension_numbers = #tpu.dot_dimension_numbers<[1], [0], [0], [1], [0, 0, 1, 1], [], []>} : vector<16x32xf32>, vector<32x32xf32>, vector<16x32xf32> -> vector<16x32xf32>
    %c0_3 = arith.constant 0 : index
    %c0_4 = arith.constant 0 : index
    %3 = vector.load %arg2[%c0_3, %c0_4] : memref<1x32xf32, #tpu.memory_space<vmem>>, vector<1x32xf32>
    %4 = vector.broadcast %3 : vector<1x32xf32> to vector<16x32xf32>
    %5 = arith.addf %2, %4 : vector<16x32xf32>
    %cst_5 = arith.constant 0.000000e+00 : f32
    %6 = vector.broadcast %cst_5 : f32 to vector<16x32xf32>
    %7 = arith.maximumf %5, %6 : vector<16x32xf32>
    %c0_6 = arith.constant 0 : index
    %c0_7 = arith.constant 0 : index
    %8 = vector.load %arg3[%c0_6, %c0_7] : memref<32x32xf32, #tpu.memory_space<vmem>>, vector<32x32xf32>
    %cst_8 = arith.constant dense<0.000000e+00> : vector<16x32xf32>
    %9 = tpu.matmul %7, %8, %cst_8 {dimension_numbers = #tpu.dot_dimension_numbers<[1], [0], [0], [1], [0, 0, 1, 1], [], []>} : vector<16x32xf32>, vector<32x32xf32>, vector<16x32xf32> -> vector<16x32xf32>
    %c0_9 = arith.constant 0 : index
    %c0_10 = arith.constant 0 : index
    %10 = vector.load %arg4[%c0_9, %c0_10] : memref<1x32xf32, #tpu.memory_space<vmem>>, vector<1x32xf32>
    %11 = vector.broadcast %10 : vector<1x32xf32> to vector<16x32xf32>
    %12 = arith.addf %9, %11 : vector<16x32xf32>
    %cst_11 = arith.constant 0.000000e+00 : f32
    %13 = vector.broadcast %cst_11 : f32 to vector<16x32xf32>
    %14 = arith.maximumf %12, %13 : vector<16x32xf32>
    %15 = vector.shape_cast %14 : vector<16x32xf32> to vector<2x8x32xf32>
    %cst_12 = arith.constant dense<0.000000e+00> : vector<2x8x8xf32>
    %16 = tpu.matmul %15, %15, %cst_12 {dimension_numbers = #tpu.dot_dimension_numbers<[2], [2], [1], [1], [0, 0, 0, 1, 1, 1], [0], [0]>} : vector<2x8x32xf32>, vector<2x8x32xf32>, vector<2x8x8xf32> -> vector<2x8x8xf32>
    %17 = tpu.iota {dimensions = array<i32: 0>} : vector<8x8xi32>
    %18 = tpu.iota {dimensions = array<i32: 1>} : vector<8x8xi32>
    %19 = arith.cmpi eq, %17, %18 : vector<8x8xi32>
    %20 = arith.extui %19 : vector<8x8xi1> to vector<8x8xi32>
    %21 = arith.sitofp %20 : vector<8x8xi32> to vector<8x8xf32>
    %22 = vector.shape_cast %21 : vector<8x8xf32> to vector<1x8x8xf32>
    %23 = vector.broadcast %22 : vector<1x8x8xf32> to vector<2x8x8xf32>
    %24 = arith.addf %16, %23 : vector<2x8x8xf32>
    %cst_13 = arith.constant dense<0.000000e+00> : vector<2x8xf32>
    %25 = vector.multi_reduction <add>, %24, %cst_13 [2] : vector<2x8x8xf32> to vector<2x8xf32>
    %26 = vector.shape_cast %25 : vector<2x8xf32> to vector<2x8x1xf32>
    %cst_14 = arith.constant dense<0.000000e+00> : vector<2x8xf32>
    %27 = vector.multi_reduction <add>, %24, %cst_14 [1] : vector<2x8x8xf32> to vector<2x8xf32>
    %28 = vector.shape_cast %27 : vector<2x8xf32> to vector<2x1x8xf32>
    %29 = math.rsqrt %26 : vector<2x8x1xf32>
    %30 = vector.broadcast %29 : vector<2x8x1xf32> to vector<2x8x8xf32>
    %31 = arith.mulf %30, %24 : vector<2x8x8xf32>
    %32 = math.rsqrt %28 : vector<2x1x8xf32>
    %33 = vector.broadcast %32 : vector<2x1x8xf32> to vector<2x8x8xf32>
    %34 = arith.mulf %31, %33 : vector<2x8x8xf32>
    %c0_15 = arith.constant 0 : index
    %c0_16 = arith.constant 0 : index
    %c0_17 = arith.constant 0 : index
    %35 = vector.load %arg9[%c0_15, %c0_16, %c0_17] : memref<2x8x8xf32, #tpu.memory_space<vmem>>, vector<2x8x8xf32>
    tpu.vector_store %arg9[%c0_15, %c0_16, %c0_17], %34 {strides = array<i32>} : memref<2x8x8xf32, #tpu.memory_space<vmem>>, vector<2x8x8xf32>,
    %c0_18 = arith.constant 0 : index
    %c0_19 = arith.constant 0 : index
    %36 = vector.load %arg5[%c0_18, %c0_19] : memref<32x48xf32, #tpu.memory_space<vmem>>, vector<32x48xf32>
    %c0_20 = arith.constant 0 : index
    %c0_21 = arith.constant 0 : index
    %37 = vector.load %arg6[%c0_20, %c0_21] : memref<1x48xf32, #tpu.memory_space<vmem>>, vector<1x48xf32>
    %c0_22 = arith.constant 0 : index
    %c0_23 = arith.constant 0 : index
    %38 = vector.load %arg7[%c0_22, %c0_23] : memref<48x32xf32, #tpu.memory_space<vmem>>, vector<48x32xf32>
    %c0_24 = arith.constant 0 : index
    %c0_25 = arith.constant 0 : index
    %39 = vector.load %arg8[%c0_24, %c0_25] : memref<1x32xf32, #tpu.memory_space<vmem>>, vector<1x32xf32>
    %cst_26 = arith.constant dense<0.000000e+00> : vector<16x48xf32>
    %40 = tpu.matmul %0, %36, %cst_26 {dimension_numbers = #tpu.dot_dimension_numbers<[1], [0], [0], [1], [0, 0, 1, 1], [], []>} : vector<16x32xf32>, vector<32x48xf32>, vector<16x48xf32> -> vector<16x48xf32>
    %41 = vector.shape_cast %40 : vector<16x48xf32> to vector<2x8x48xf32>
    %cst_27 = arith.constant dense<0.000000e+00> : vector<2x8x48xf32>
    %42 = tpu.matmul %34, %41, %cst_27 {dimension_numbers = #tpu.dot_dimension_numbers<[2], [1], [1], [2], [0, 0, 0, 1, 1, 2], [0], [0]>} : vector<2x8x8xf32>, vector<2x8x48xf32>, vector<2x8x48xf32> -> vector<2x8x48xf32>
    %43 = vector.shape_cast %37 : vector<1x48xf32> to vector<1x1x48xf32>
    %44 = vector.broadcast %43 : vector<1x1x48xf32> to vector<2x8x48xf32>
    %45 = arith.addf %42, %44 : vector<2x8x48xf32>
    %cst_28 = arith.constant 0.000000e+00 : f32
    %46 = vector.broadcast %cst_28 : f32 to vector<2x8x48xf32>
    %47 = arith.maximumf %45, %46 : vector<2x8x48xf32>
    %48 = vector.shape_cast %47 : vector<2x8x48xf32> to vector<16x48xf32>
    %cst_29 = arith.constant dense<0.000000e+00> : vector<16x32xf32>
    %49 = tpu.matmul %48, %38, %cst_29 {dimension_numbers = #tpu.dot_dimension_numbers<[1], [0], [0], [1], [0, 0, 1, 1], [], []>} : vector<16x48xf32>, vector<48x32xf32>, vector<16x32xf32> -> vector<16x32xf32>
    %50 = vector.shape_cast %49 : vector<16x32xf32> to vector<2x8x32xf32>
    %cst_30 = arith.constant dense<0.000000e+00> : vector<2x8x32xf32>
    %51 = tpu.matmul %34, %50, %cst_30 {dimension_numbers = #tpu.dot_dimension_numbers<[2], [1], [1], [2], [0, 0, 0, 1, 1, 2], [0], [0]>} : vector<2x8x8xf32>, vector<2x8x32xf32>, vector<2x8x32xf32> -> vector<2x8x32xf32>
    %52 = vector.shape_cast %39 : vector<1x32xf32> to vector<1x1x32xf32>
    %53 = vector.broadcast %52 : vector<1x1x32xf32> to vector<2x8x32xf32>
    %54 = arith.addf %51, %53 : vector<2x8x32xf32>
    %55 = vector.shape_cast %54 : vector<2x8x32xf32> to vector<16x32xf32>
    %c0_31 = arith.constant 0 : index
    %c0_32 = arith.constant 0 : index
    %56 = vector.load %arg10[%c0_31, %c0_32] : memref<16x32xf32, #tpu.memory_space<vmem>>, vector<16x32xf32>
    tpu.vector_store %arg10[%c0_31, %c0_32], %55 {strides = array<i32>} : memref<16x32xf32, #tpu.memory_space<vmem>>, vector<16x32xf32>,
    return
  }
}

</mosaic_0001>

<bundles_post_ra>
// kernel: tpu_custom_call.1
= control target key start
LH: loop header
LB: loop body
LE: loop exit
PB: predicated region body
PF: predicated region fallthrough
CT: control target
= control target key end

     0   :  { %16 = vsyncpa [#allocation3], 0  ;;  %s1324_s0 = inlined_call_operand.vmem [shape: f32[16,32], index: 0, kind: input, shape index: {}]   ;;  %s1325_s1 = inlined_call_operand.vmem [shape: f32[32,32], index: 1, kind: input, shape index: {}]   ;;  %s1326_s2 = inlined_call_operand.vmem [shape: f32[1,32], index: 2, kind: input, shape index: {}]   ;;  %s1327_s3 = inlined_call_operand.vmem [shape: f32[32,32], index: 3, kind: input, shape index: {}]   ;;  %s1328_s4 = inlined_call_operand.vmem [shape: f32[1,32], index: 4, kind: input, shape index: {}]   ;;  %s1329_s5 = inlined_call_operand.hbm [shape: f32[32,48], index: 5, kind: input, shape index: {}]   ;;  %s1330_s6 = inlined_call_operand.vmem [shape: f32[1,48], index: 6, kind: input, shape index: {}]   ;;  %s1331_s7 = inlined_call_operand.vmem [shape: f32[48,32], index: 7, kind: input, shape index: {}]   ;;  %s1332_s8 = inlined_call_operand.vmem [shape: f32[1,32], index: 8, kind: input, shape index: {}]   ;;  %s1333_s9 = inlined_call_operand.hbm [shape: f32[2,8,8], index: 9, kind: output, shape index: {0}]   ;;  %s1334_s10 = inlined_call_operand.hbm [shape: f32[16,32], index: 10, kind: output, shape index: {1}]  }
   0x1   :  { %17 = vsyncpa [#allocation4], 0 }
   0x2   :  { %18 = vsyncpa [#allocation7], 0  ;;  %s1145_s13 = smov [#allocation2]  }
   0x3   :  { %s34_s14 = sshll.u32 %s1145_s13, 4  ;;  %s35_s14 = int_to_ptr.vmem [resolvable:$true] %s34_s14 }
   0x4   :  { %s1087_s15 = scalar_lea.vmem %s35_s14, 512  ;;  %p1092_p1 = scmp.lt.s32.totalorder %s35_s14, %s35_s14 }
   0x5   :  { %p1088_p0 = scmp.ne.s32.totalorder %s35_s14, %s1087_s15  ;;  %p1093_p2 = scmp.lt.s32.totalorder %s1087_s15, %s1087_s15 }
   0x7   :  { %p1094_p3 = por %p1093_p2, %p1092_p1 }
   0x9   :  { %p1095_p4 = pnand %p1094_p3, %p1088_p0 }
   0xb   :  { %1098 = shalt.err (!%p1095_p4)
}
   0xc   :  { %s1146_s16 = smov 128   ;;  %s1147_s17 = smov 8  }
   0xd   :  { %40 = dma.hbm_to_vmem [thread:$0]  %s1329_s5, 512, %s35_s14, [#allocation3], %s1146_s16, %s1146_s16, %s1147_s17  }
   0xe   :  { %1139 = dma.done.wait [#allocation3], 512  }
   0xf   :  { %1140 = vsyncadd [#allocation3], 4294966784  ;;  %vm63_vm0 = vcmask 261120   ;;  %v55_v0 = vld [vmem:[%s1325_s1 + $0x18] sm:$0xff]  ;;  %v54_v1 = vld [vmem:[%s1325_s1 + $0x10] sm:$0xff]  ;;  %v1148_v17 = vmov 0.0   ;;  %v241_v29 = vlaneseq }
  0x10   :  { %986 = vmatprep.subr.mxu0 %v55_v0  ;;  %v50_v2 = vld [vmem:[%s1324_s0] sm:$0xff]  ;;  %v53_v3 = vld [vmem:[%s1325_s1 + $0x8] sm:$0xff]  ;;  %v150_v6 = vld [vmem:[%s1327_s3 + $0x18] sm:$0xff]  ;;  %vm1149_vm1 = vmmov 0   ;;  %vm394_vm3 = vcmask 64512   ;;  %vm664_vm4 = vcmask 392192  }
  0x11   :  { %987 = vmatpush3.msra.mxu0 %v55_v0  ;;  %994 = vmatprep.mubr.msk.f32.mxu0 %vm63_vm0, %v50_v2  ;;  %v52_v4 = vld [vmem:[%s1325_s1] sm:$0xff]  ;;  %v51_v5 = vld [vmem:[%s1324_s0 + $0x8] sm:$0xff]  ;;  %v149_v7 = vld [vmem:[%s1327_s3 + $0x10] sm:$0xff]  ;;  %v242_v30 = vshrl.u32 %v241_v29, 7  ;;  %v244_v31 = vand.u32 127, %v241_v29 }
  0x12   :  { %988 = vmatprep.subr.mxu0 %v54_v1  ;;  %997 = vmatprep.subr.mxu1 %v150_v6  ;;  %v148_v8 = vld [vmem:[%s1327_s3 + $0x8] sm:$0xff]  ;;  %v147_v9 = vld [vmem:[%s1327_s3] sm:$0xff]  ;;  %v426_v25 = vld [vmem:[#allocation2 + $0x18] sm:$0xff] }
  0x13   :  { %989 = vmatpush3.msra.mxu0 %v54_v1  ;;  %998 = vmatpush3.msra.mxu1 %v150_v6  ;;  %v927_v10 = vld [vmem:[%s1326_s2] ss:$0 sm:$0xff]  ;;  %v425_v26 = vld [vmem:[#allocation2 + $0x10] sm:$0xff]  ;;  %v424_v27 = vld [vmem:[#allocation2 + $0x8] sm:$0xff]  ;;  %vm245_vm2 = vcmp.eq.s32.totalorder %v242_v30, %v244_v31 }
  0x14   :  { %990 = vmatprep.subr.mxu0 %v53_v3  ;;  %999 = vmatprep.subr.mxu1 %v149_v7  ;;  %v930_v18 = vld [vmem:[%s1328_s4] ss:$0 sm:$0xff]  ;;  %v933_v33 = vsel %vm245_vm2, 1.0, %v1148_v17  ;;  %v433_v43 = vld [vmem:[%s1331_s7 + $0x28] sm:$0xff] }
  0x15   :  { %991 = vmatpush3.msra.mxu0 %v53_v3  ;;  %1000 = vmatpush3.msra.mxu1 %v149_v7  ;;  %v423_v28 = vld [vmem:[#allocation2] sm:$0xff]  ;;  %v431_v3 = vld [vmem:[%s1331_s7 + $0x18] sm:$0xff] }
  0x16   :  { %992 = vmatprep.subr.mxu0 %v52_v4  ;;  %1001 = vmatprep.subr.mxu1 %v148_v8  ;;  %v432_v44 = vld [vmem:[%s1331_s7 + $0x20] sm:$0xff] }
  0x17   :  { %993 = vmatpush3.msra.mxu0 %v52_v4  ;;  %1002 = vmatpush3.msra.mxu1 %v148_v8  ;;  %v430_v4 = vld [vmem:[%s1331_s7 + $0x10] sm:$0xff]  ;;  %v428_v6 = vld [vmem:[%s1331_s7] sm:$0xff] }
  0x18   :  { %995 = vmatmul.mubr.msk.f32.vlgmr.msra.gmra.mxu0 %vm63_vm0, %v51_v5  ;;  %1003 = vmatprep.subr.mxu1 %v147_v9  ;;  %v940_v7 = vld [vmem:[%s1330_s6] ss:$0 sm:$0xff]  ;;  %s1150_s6 = smov [#allocation5]  }
  0x19   :  { %1004 = vmatpush3.msra.mxu1 %v147_v9  ;;  %1008 = vmatprep.subr.mxu0 %v1148_v17 }
  0x1a   :  { %1013 = vmatprep.subr.mxu1 %v1148_v17  ;;  %1010 = vmatprep.mubr.msk.f32.mxu0 %vm1149_vm1, %v1148_v17 }
  0xd8   :  { %v996_v11 = vpop.f32.mrf.mxu0 }
  0xd9   :  { %v142_v12 = vadd.f32 %v996_v11, %v927_v10 }
  0xda   :  { %v136_v13 = vpop.f32.mrf.mxu0 }
  0xdb   :  { %v137_v14 = vadd.f32 %v927_v10, %v136_v13  ;;  %v146_v16 = vmax.f32 %v142_v12, 0.0 }
  0xdd   :  { %v145_v15 = vmax.f32 %v137_v14, 0.0 }
  0xdf   :  { %1005 = vmatprep.mubr.msk.f32.mxu1 %vm63_vm0, %v145_v15 }
  0xe0   :  { %1006 = vmatmul.mubr.msk.f32.vlgmr.msra.gmra.mxu1 %vm63_vm0, %v146_v16 }
  0xe1   :  { %1015 = vmatprep.mubr.msk.f32.mxu1 %vm1149_vm1, %v1148_v17 }
 0x1a0   :  { %v1007_v19 = vpop.f32.mrf.mxu1 }
 0x1a1   :  { %v236_v20 = vadd.f32 %v1007_v19, %v930_v18 }
 0x1a2   :  { %v230_v21 = vpop.f32.mrf.mxu1 }
 0x1a3   :  { %v240_v22 = vmax.f32 %v236_v20, 0.0  ;;  %v231_v23 = vadd.f32 %v930_v18, %v230_v21 }
 0x1a5   :  { %v239_v24 = vmax.f32 %v231_v23, 0.0  ;;  %1014 = vmatpush3.xpose.msk.msra.mxu1 %vm63_vm0, %v240_v22 }
 0x1a6   :  { %1029 = vmatprep.subr.mxu1 %v1148_v17 }
 0x1a7   :  { %1009 = vmatpush3.xpose.msk.msra.mxu0 %vm63_vm0, %v239_v24 }
 0x1a8   :  { %1016 = vmatmul.mubr.msk.f32.vlgmr.msra.gmra.mxu1 %vm63_vm0, %v240_v22  ;;  %1018 = vmatprep.subr.mxu0 %v426_v25 }
 0x1a9   :  { %1031 = vmatprep.mubr.msk.f32.mxu1 %vm1149_vm1, %v1148_v17 }
 0x1aa   :  { %1011 = vmatmul.mubr.msk.f32.vlgmr.msra.gmra.mxu0 %vm63_vm0, %v239_v24 }
 0x1ab   :  { %1019 = vmatpush3.msra.mxu0 %v426_v25  ;;  %1026 = vmatprep.mubr.msk.f32.mxu0 %vm63_vm0, %v50_v2 }
 0x1ac   :  { %1020 = vmatprep.subr.mxu0 %v425_v26 }
 0x1ad   :  { %1021 = vmatpush3.msra.mxu0 %v425_v26 }
 0x1ae   :  { %1022 = vmatprep.subr.mxu0 %v424_v27 }
 0x1af   :  { %1023 = vmatpush3.msra.mxu0 %v424_v27 }
 0x1b0   :  { %1024 = vmatprep.subr.mxu0 %v423_v28 }
 0x1b1   :  { %1025 = vmatpush3.msra.mxu0 %v423_v28 }
 0x1b2   :  { %1027 = vmatmul.mubr.msk.f32.vlgmr.msra.gmra.mxu0 %vm63_vm0, %v51_v5  ;;  %1039 = vmatprep.subr.mxu0 %v433_v43  ;;  %v429_v5 = vld [vmem:[%s1331_s7 + $0x8] sm:$0xff]  ;;  %s899_s7 = sshll.u32 %s1150_s6, 4  ;;  %s900_s7 = int_to_ptr.vmem [resolvable:$true] %s899_s7 }
 0x1b3   :  { %1040 = vmatpush3.msra.mxu0 %v433_v43  ;;  %s1099_s13 = scalar_lea.vmem %s900_s7, 256  ;;  %p1104_p6 = scmp.lt.s32.totalorder %s900_s7, %s900_s7 }
 0x1b4   :  { %1041 = vmatprep.subr.mxu0 %v432_v44  ;;  %p1100_p5 = scmp.ne.s32.totalorder %s900_s7, %s1099_s13  ;;  %p1105_p7 = scmp.lt.s32.totalorder %s1099_s13, %s1099_s13 }
 0x1b5   :  { %1042 = vmatpush3.msra.mxu0 %v432_v44 }
 0x1b6   :  { %1043 = vmatprep.subr.mxu0 %v431_v3  ;;  %p1106_p8 = por %p1105_p7, %p1104_p6 }
 0x1b7   :  { %1044 = vmatpush3.msra.mxu0 %v431_v3 }
 0x1b8   :  { %1045 = vmatprep.subr.mxu0 %v430_v4  ;;  %p1107_p9 = pnand %p1106_p8, %p1100_p5 }
 0x1b9   :  { %1046 = vmatpush3.msra.mxu0 %v430_v4 }
 0x1ba   :  { %1047 = vmatprep.subr.mxu0 %v429_v5 }
 0x1bb   :  { %1048 = vmatpush3.msra.mxu0 %v429_v5 }
 0x1bc   :  { %1049 = vmatprep.subr.mxu0 %v428_v6 }
 0x1bd   :  { %1050 = vmatpush3.msra.mxu0 %v428_v6 }
 0x268   :  { %v390_v32 = vpop.f32.mrf.mxu1 }
 0x269   :  { %v391_v38 = vadd.f32 %v933_v33, %v390_v32 }
 0x26a   :  { %v317_v34 = vpop.f32.mrf.mxu0  ;;  %v1017_v35 = vpop.f32.mrf.mxu1 }
 0x26b   :  { %v318_v36 = vadd.f32 %v933_v33, %v317_v34  ;;  %v398_v40 = vsel %vm394_vm3, %v391_v38, 0.0 }
 0x26c   :  { %v1012_v37 = vpop.f32.mrf.mxu0  ;;  %v407_v47 = vrot.slane %v398_v40, 4 }
 0x26d   :  { %v395_v39 = vsel %vm394_vm3, %v318_v36, 0.0 }
 0x26e   :  { %396 = vadd.xlane.f32.xlu0 %v395_v39  ;;  %v401_v45 = vrot.slane %v395_v39, 4  ;;  %v408_v49 = vadd.f32 %v407_v47, %v398_v40 }
 0x270   :  { %v402_v46 = vadd.f32 %v401_v45, %v395_v39  ;;  %v409_v51 = vrot.slane %v408_v49, 2 }
 0x272   :  { %399 = vadd.xlane.f32.xlu0 %v398_v40  ;;  %v1028_v41 = vpop.f32.mrf.mxu0  ;;  %v403_v48 = vrot.slane %v402_v46, 2  ;;  %v410_v53 = vadd.f32 %v409_v51, %v408_v49 }
 0x274   :  { %v501_v42 = vpop.f32.mrf.mxu0  ;;  %v404_v50 = vadd.f32 %v403_v48, %v402_v46  ;;  %v411_v55 = vrot.slane %v410_v53, 1 }
 0x275   :  { %1030 = vmatpush3.msra.mxu1 %v501_v42 }
 0x276   :  { %1034 = vmatprep.subr.mxu1 %v1148_v17  ;;  %v405_v52 = vrot.slane %v404_v50, 1  ;;  %v412_v57 = vadd.f32 %v411_v55, %v410_v53 }
 0x278   :  { %v406_v54 = vadd.f32 %v405_v52, %v404_v50 }
 0x2f7   :  { %v397_v56 = vpop.xlane.xlu0 %396 }
 0x2f8   :  { %1071 = vrsqrt.f32 %v397_v56 }
 0x2f9   :  { %1073 = vrsqrt.f32 %v406_v54 }
 0x2fb   :  { %v400_v58 = vpop.xlane.xlu0 %399 }
 0x2fc   :  { %1075 = vrsqrt.f32 %v400_v58 }
 0x2fd   :  { %1077 = vrsqrt.f32 %v412_v57 }
 0x305   :  { %v1072_v59 = vpop.eup %1071 }
 0x306   :  { %v415_v60 = vmul.f32 %v1072_v59, %v318_v36  ;;  %v1074_v61 = vpop.eup %1073 }
 0x308   :  { %v419_v62 = vmul.f32 %v1074_v61, %v415_v60 }
 0x309   :  { %v1076_v63 = vpop.eup %1075 }
 0x30a   :  { %v416_v0 = vmul.f32 %v1076_v63, %v391_v38  ;;  %1032 = vmatmul.mubr.msk.f32.vlgmr.msra.gmra.mxu1 %vm394_vm3, %v419_v62  ;;  %421 = vst.msk [vmem:[#allocation5] sm:$0xff] %vm394_vm3, %v419_v62  ;;  %v1078_v1 = vpop.eup %1077 }
 0x30b   :  { %1035 = vmatpush3.msra.mxu1 %v1028_v41  ;;  %1036 = vmatprep.mubr.msk.f32.mxu1 %vm1149_vm1, %v1148_v17 }
 0x30c   :  { %v420_v2 = vmul.f32 %v1078_v1, %v416_v0  ;;  %1054 = vmatprep.subr.mxu1 %v1148_v17 }
 0x30e   :  { %1037 = vmatmul.mubr.msk.f32.vlgmr.msra.gmra.mxu1 %vm394_vm3, %v420_v2  ;;  %422 = vst.msk [vmem:[#allocation5 + $0x8] sm:$0xff] %vm394_vm3, %v420_v2 }
 0x30f   :  { %1056 = vmatprep.mubr.msk.f32.mxu1 %vm1149_vm1, %v1148_v17 }
 0x3ca   :  { %v585_v8 = vpop.f32.mrf.mxu1 }
 0x3cb   :  { %v586_v9 = vadd.f32 %v940_v7, %v585_v8 }
 0x3cc   :  { %v1033_v10 = vpop.f32.mrf.mxu1 }
 0x3cd   :  { %v662_v11 = vmax.f32 %v586_v9, 0.0 }
 0x3ce   :  { %v658_v12 = vpop.f32.mrf.mxu1 }
 0x3cf   :  { %v659_v13 = vadd.f32 %v940_v7, %v658_v12  ;;  %1051 = vmatprep.mubr.msk.f32.mxu0 %vm664_vm4, %v662_v11 }
 0x3d0   :  { %v1038_v14 = vpop.f32.mrf.mxu1 }
 0x3d1   :  { %v663_v15 = vmax.f32 %v659_v13, 0.0 }
 0x3d3   :  { %1052 = vmatmul.mubr.msk.f32.vlgmr.msra.gmra.mxu0 %vm664_vm4, %v663_v15 }
 0x493   :  { %v1053_v16 = vpop.f32.mrf.mxu0 }
 0x495   :  { %v737_v18 = vpop.f32.mrf.mxu0 }
 0x496   :  { %1055 = vmatpush3.msra.mxu1 %v737_v18 }
 0x497   :  { %1057 = vmatmul.mubr.msk.f32.vlgmr.msra.gmra.mxu1 %vm394_vm3, %v419_v62  ;;  %1059 = vmatprep.subr.mxu1 %v1148_v17 }
 0x498   :  { %1060 = vmatpush3.msra.mxu1 %v1053_v16  ;;  %1061 = vmatprep.mubr.msk.f32.mxu1 %vm1149_vm1, %v1148_v17 }
 0x49b   :  { %1062 = vmatmul.mubr.msk.f32.vlgmr.msra.gmra.mxu1 %vm394_vm3, %v420_v2 }
 0x49c   :  { %1110 = shalt.err (!%p1107_p9)
}
 0x49d   :  { %905 = dma.vmem_to_hbm [thread:$0]  %s900_s7, 256, %s1333_s9, [#allocation4], %s1146_s16, %s1146_s16, %s1147_s17  }
 0x49e   :  { %v945_v17 = vld [vmem:[%s1332_s8] ss:$0 sm:$0xff]  ;;  %s1151_s18 = smov [#allocation6]  }
 0x49f   :  { %s911_s19 = sshll.u32 %s1151_s18, 4  ;;  %s912_s19 = int_to_ptr.vmem [resolvable:$true] %s911_s19 }
 0x4a0   :  { %s1119_s20 = scalar_lea.vmem %s912_s19, 256  ;;  %p1124_p11 = scmp.lt.s32.totalorder %s912_s19, %s912_s19 }
 0x4a1   :  { %p1120_p10 = scmp.ne.s32.totalorder %s912_s19, %s1119_s20  ;;  %p1125_p12 = scmp.lt.s32.totalorder %s1119_s20, %s1119_s20 }
 0x4a3   :  { %p1126_p13 = por %p1125_p12, %p1124_p11 }
 0x4a5   :  { %p1127_p0 = pnand %p1126_p13, %p1120_p10 }
 0x557   :  { %v818_v19 = vpop.f32.mrf.mxu1 }
 0x558   :  { %v819_v20 = vadd.f32 %v945_v17, %v818_v19 }
 0x559   :  { %v1058_v21 = vpop.f32.mrf.mxu1 }
 0x55a   :  { %892 = vst.msk [vmem:[#allocation6] sm:$0xff] %vm63_vm0, %v819_v20 }
 0x55b   :  { %v888_v22 = vpop.f32.mrf.mxu1 }
 0x55c   :  { %v889_v23 = vadd.f32 %v945_v17, %v888_v22 }
 0x55d   :  { %v1063_v24 = vpop.f32.mrf.mxu1 }
 0x55e   :  { %893 = vst.msk [vmem:[#allocation6 + $0x8] sm:$0xff] %vm63_vm0, %v889_v23 }
 0x55f   :  { %1130 = shalt.err (!%p1127_p0)
}
 0x560   :  { %917 = dma.vmem_to_hbm [thread:$0]  %s912_s19, 256, %s1334_s10, [#allocation7], %s1146_s16, %s1146_s16, %s1147_s17  }
 0x561   :  { %1141 = dma.done.wait [#allocation4], 256  }
 0x562   :  { %1142 = vsyncadd [#allocation4], 4294967040 }
 0x563   :  { %1143 = dma.done.wait [#allocation7], 256  }
 0x564   :  { %1144 = vsyncadd [#allocation7], 4294967040 }
 0x565   :  { %924 = vsyncpa [#allocation3], 1 }
 0x566   :  { %925 = vsyncpa [#allocation4], 1 }
 0x567   :  { %926 = vsyncpa [#allocation7], 1 }

</bundles_post_ra>
